<compile_context>
chip_gen: v7x
topology: tpu7x:2x2x1
jax: 0.10.0
libtpu: 0.0.40
codegen_flags: <defaults>
</compile_context>

<pallas_src>
import functools

import jax
import jax.numpy as jnp
from jax.experimental import pallas as pl
from jax.experimental.pallas import tpu as pltpu


def _round_up(x, m):
    return ((x + m - 1) // m) * m


def _vmem_cap_bytes():
    """Physical VMEM per TensorCore (64 MiB floor if the query is unavailable)."""
    try:
        return int(pltpu.get_tpu_info().vmem_capacity_bytes)
    except Exception:
        return 64 * 2**20


def _dsne_kernel(fts_t_ref, sqs_ref, yt_ref, cbias_ref,
                 ftt_ref, sqt_ref, ys_ref, out_ref, *,
                 margin, has_col_pad):
    # fts_t_ref : (K_pad, M_pad)  source features, pre-transposed (resident)
    # sqs_ref   : (1, M_pad)      f32 0.5*||s_j||^2 (resident)
    # yt_ref    : (1, M_pad)      i32 target-domain labels (resident)
    # cbias_ref : (1, M_pad)      f32 0.0 valid col / -inf padded col (resident)
    # ftt_ref   : (T, K_pad)      target-feature row tile (streamed)
    # sqt_ref   : (T, 1)          f32 0.5*||t_i||^2 (streamed)
    # ys_ref    : (T, 1)          i32 source-domain labels (streamed)
    # out_ref   : (T, 1)          per-row hinge loss

    # Single MXU matmul per step: (T, K) @ (K, M), f32 accumulation.
    cross = jax.lax.dot_general(
        ftt_ref[...], fts_t_ref[...],
        dimension_numbers=(((1,), (0,)), ((), ())),
        preferred_element_type=jnp.float32)                        # (T, M_pad)

    # half_dists = 0.5*||t - s||^2 = 0.5||t||^2 + 0.5||s||^2 - <t, s>
    # (factor 2 re-applied on the (T,1) results); clamp guards cancellation.
    half = jnp.maximum(sqt_ref[...] + sqs_ref[...] - cross, 0.0)   # (T, M_pad)

    # y_same[i, j] = (ys[i] == yt[j])  — index swap of the original, as-is.
    y_same = ys_ref[...] == yt_ref[...]                            # (T, M_pad)

    if has_col_pad:
        bias = cbias_ref[...]          # 0 valid column, -inf padded column
        half_lo = half + bias          # padded cols -> -inf (excluded from max)
        half_hi = half - bias          # padded cols -> +inf (excluded from min)
    else:
        half_lo = half
        half_hi = half

    # Three independent single-pass row reductions (no `revised` temporary;
    # min(min over inter-class cols, max_dists) is exactly the PyTorch result).
    max_dists = jnp.max(half_lo, axis=1, keepdims=True)                   # (T,1)
    max_intra = jnp.max(jnp.where(y_same, half_lo, 0.0),
                        axis=1, keepdims=True)                            # (T,1)
    min_inter = jnp.minimum(
        jnp.min(jnp.where(y_same, jnp.inf, half_hi), axis=1, keepdims=True),
        max_dists)                                                        # (T,1)

    out_ref[...] = jnp.maximum(2.0 * (max_intra - min_inter) + margin, 0.0)


def _build_dsne_call(kernel, *, n_pad, m_pad, k_pad, tile_n, num_tiles,
                     vmem_limit, resident_mode):
    if resident_mode is None:
        def resident(shape):
            return pl.BlockSpec(shape, lambda i: (0, 0))
    else:
        def resident(shape):
            return pl.BlockSpec(shape, lambda i: (0, 0),
                                pipeline_mode=resident_mode)
    return pl.pallas_call(
        kernel,
        out_shape=jax.ShapeDtypeStruct((n_pad, 1), jnp.float32),
        grid_spec=pltpu.PrefetchScalarGridSpec(
            num_scalar_prefetch=0,
            grid=(num_tiles,),
            in_specs=[
                resident((k_pad, m_pad)),                          # fts^T
                resident((1, m_pad)),                              # 0.5*||s||^2
                resident((1, m_pad)),                              # yt labels
                resident((1, m_pad)),                              # column bias
                pl.BlockSpec((tile_n, k_pad), lambda i: (i, 0)),   # ftt row tile
                pl.BlockSpec((tile_n, 1), lambda i: (i, 0)),       # 0.5*||t||^2
                pl.BlockSpec((tile_n, 1), lambda i: (i, 0)),       # ys labels
            ],
            out_specs=pl.BlockSpec((tile_n, 1), lambda i: (i, 0)),
        ),
        compiler_params=pltpu.CompilerParams(
            dimension_semantics=("parallel",),
            vmem_limit_bytes=vmem_limit),
    )


def dsne_loss(fts, ys, ftt, yt, margin=1.0, fn=False, *, tile_n=128,
              use_bf16=True):
    """Pallas implementation of DSNE_Loss.forward (fn=False path).

    use_bf16: bf16 features into the MXU with f32 accumulation and f32 norms
    (default on — halves resident-fts VMEM and feature DMA bytes).
    """
    assert not fn  # TODO(synk): fn=True L2-normalization not implemented — the
    # original PyTorch broadcast `fts / torch.norm(fts, dim=1)` is
    # shape-inconsistent unless M == K.
    fts = jnp.asarray(fts).astype(jnp.float32)
    ftt = jnp.asarray(ftt).astype(jnp.float32)
    ys = jnp.asarray(ys).reshape(-1).astype(jnp.int32)
    yt = jnp.asarray(yt).reshape(-1).astype(jnp.int32)

    M, K = fts.shape
    N, Kt = ftt.shape
    assert K == Kt
    assert M == N, "DSNE_Loss requires equal source/target batch sizes"

    # ---- Alignment / tiling ----------------------------------------------
    k_pad = _round_up(K, 128)                 # MXU contraction dim
    m_pad = _round_up(M, 128)                 # lane dim of the dists slab
    tile_n = _round_up(max(8, min(tile_n, _round_up(N, 8))), 8)
    # Megacore (v7x, 2 TCs): make sure a mid-size N yields >= 2 grid steps.
    if N >= 16 and _round_up(N, tile_n) // tile_n == 1:
        tile_n = _round_up((N + 1) // 2, 8)
    n_pad = _round_up(N, tile_n)
    num_tiles = n_pad // tile_n

    # ---- Wrapper-side precompute (f32 half-norms, transposed source) ------
    sqs_half = 0.5 * jnp.sum(fts * fts, axis=1)
    sqt_half = 0.5 * jnp.sum(ftt * ftt, axis=1)

    feat_dtype = jnp.bfloat16 if use_bf16 else jnp.float32
    fts_c = fts.astype(feat_dtype)
    ftt_c = ftt.astype(feat_dtype)
    # Pad only when actually unaligned (skip the extra HBM pre-pass otherwise).
    if m_pad != M or k_pad != K:
        fts_c = jnp.pad(fts_c, ((0, m_pad - M), (0, k_pad - K)))
    if n_pad != N or k_pad != K:
        ftt_c = jnp.pad(ftt_c, ((0, n_pad - N), (0, k_pad - K)))
    fts_t = fts_c.T                           # (K_pad, M_pad): canonical MXU RHS

    sqs_row = jnp.pad(sqs_half, (0, m_pad - M)) if m_pad != M else sqs_half
    sqs_row = sqs_row.reshape(1, m_pad)
    sqt_col = jnp.pad(sqt_half, (0, n_pad - N)) if n_pad != N else sqt_half
    sqt_col = sqt_col.reshape(n_pad, 1)

    sentinel = int(jnp.iinfo(jnp.int32).min)  # never matches a real label
    yt_row = (jnp.pad(yt, (0, m_pad - M), constant_values=sentinel)
              if m_pad != M else yt).reshape(1, m_pad)
    ys_col = (jnp.pad(ys, (0, n_pad - N)) if n_pad != N else ys).reshape(n_pad, 1)

    has_col_pad = m_pad != M
    # Grid-invariant column bias (replaces a per-step iota + compares):
    cbias = jnp.zeros((m_pad,), jnp.float32)
    if has_col_pad:
        cbias = cbias.at[M:].set(-jnp.inf)
    cbias = cbias.reshape(1, m_pad)

    # ---- VMEM budget (worst case: double-buffered residents) --------------
    feat_bytes = 2 if use_bf16 else 4
    est = (2 * (m_pad * k_pad * feat_bytes + 3 * m_pad * 4)   # residents
           + 2 * tile_n * (k_pad * feat_bytes + 3 * 4)        # streamed tiles
           + 4 * tile_n * m_pad * 4)                          # epilogue temps
    vmem_limit = int(min(_vmem_cap_bytes() - (8 << 20),
                         max(32 << 20, est + est // 2)))
    vmem_limit = max(vmem_limit, 16 << 20)
    # TODO(synk): for M large enough that resident fts^T no longer fits VMEM,
    # add a second innermost "arbitrary" grid axis over M with online
    # max/min accumulators in scratch (P3); not needed at these sizes.

    kernel = functools.partial(_dsne_kernel, margin=float(margin),
                               has_col_pad=has_col_pad)
    args = (fts_t, sqs_row, yt_row, cbias, ftt_c, sqt_col, ys_col)

    loss_col = None
    last_exc = None
    # Grid-invariant residents only need one VMEM buffer; fall back to default
    # double-buffering if this jax version rejects pipeline_mode / Buffered(1).
    for single_buffer_residents in (True, False):
        try:
            if single_buffer_residents:
                if not hasattr(pl, "Buffered"):
                    continue
                mode = pl.Buffered(1)
            else:
                mode = None
            loss_col = _build_dsne_call(
                kernel, n_pad=n_pad, m_pad=m_pad, k_pad=k_pad, tile_n=tile_n,
                num_tiles=num_tiles, vmem_limit=vmem_limit,
                resident_mode=mode)(*args)
            break
        except Exception as exc:  # pragma: no cover — older/stricter jax
            last_exc = exc
            loss_col = None
    if loss_col is None:
        raise last_exc

    # TODO(synk): output stays lane-width-1 (masked vst); a lane-dense
    # (num_tiles, tile_n) layout is a possible minor cleanup (bytes are tiny).
    # Drop padded rows; divisor is the true N.
    return jnp.mean(loss_col[:N, 0])


def _reference_dsne_loss(fts, ys, ftt, yt, margin=1.0):
    """Pure-JAX mirror of the PyTorch forward (fn=False)."""
    diff = ftt[:, None, :] - fts[None, :, :]
    dists = jnp.sum(diff * diff, axis=2)                 # (N, M)
    y_same = ys[:, None] == yt[None, :]                  # (ys[i] == yt[j])
    y_same_f = y_same.astype(jnp.float32)
    intra = dists * y_same_f
    inter = dists * (1.0 - y_same_f)
    max_dists = jnp.max(dists, axis=1, keepdims=True)
    revised_inter = jnp.where(y_same, max_dists, inter)
    loss = jnp.maximum(jnp.max(intra, axis=1) - jnp.min(revised_inter, axis=1)
                       + margin, 0.0)
    return jnp.mean(loss)


if __name__ == "__main__":
    key = jax.random.PRNGKey(0)
    k1, k2, k3, k4, k5, k6, k7, k8 = jax.random.split(key, 8)
    n_classes = 4

    # --- Test 1: tiny shapes, f32 feature path (tight tolerance) -----------
    M = N = 8
    K = 32
    fts = jax.random.normal(k1, (M, K), dtype=jnp.float32)
    ftt = jax.random.normal(k2, (N, K), dtype=jnp.float32)
    ys = jax.random.randint(k3, (M,), 0, n_classes, dtype=jnp.int32)
    yt = jax.random.randint(k4, (N,), 0, n_classes, dtype=jnp.int32)

    ref = _reference_dsne_loss(fts, ys, ftt, yt, margin=1.0)
    out = jax.block_until_ready(
        dsne_loss(fts, ys, ftt, yt, margin=1.0, use_bf16=False))
    assert jnp.allclose(out, ref, rtol=1e-3, atol=1e-3), (out, ref)

    # Default path: bf16 features into the MXU, f32 norms + accumulation.
    out_bf16 = jax.block_until_ready(dsne_loss(fts, ys, ftt, yt, margin=1.0))
    assert jnp.allclose(out_bf16, ref, rtol=5e-2, atol=2.0), (out_bf16, ref)

    # --- Test 2: unaligned shapes + multi-tile grid (padding / masking) ----
    M2 = N2 = 96
    K2 = 40
    fts2 = jax.random.normal(k5, (M2, K2), dtype=jnp.float32)
    ftt2 = jax.random.normal(k6, (N2, K2), dtype=jnp.float32)
    ys2 = jax.random.randint(k7, (M2,), 0, n_classes, dtype=jnp.int32)
    yt2 = jax.random.randint(k8, (N2,), 0, n_classes, dtype=jnp.int32)

    ref2 = _reference_dsne_loss(fts2, ys2, ftt2, yt2, margin=1.0)
    out2 = jax.block_until_ready(
        dsne_loss(fts2, ys2, ftt2, yt2, margin=1.0, tile_n=32, use_bf16=False))
    assert jnp.allclose(out2, ref2, rtol=1e-3, atol=1e-3), (out2, ref2)

    # Default tiling heuristic (2 grid steps) + default bf16 features.
    out3 = jax.block_until_ready(dsne_loss(fts2, ys2, ftt2, yt2, margin=1.0))
    assert jnp.allclose(out3, ref2, rtol=5e-2, atol=2.0), (out3, ref2)

    # --- Test 3: fully aligned shapes (no padding path, no wrapper pads) ---
    M3 = N3 = 128
    K3 = 128
    fts3 = jax.random.normal(k1, (M3, K3), dtype=jnp.float32)
    ftt3 = jax.random.normal(k2, (N3, K3), dtype=jnp.float32)
    ys3 = jax.random.randint(k3, (M3,), 0, n_classes, dtype=jnp.int32)
    yt3 = jax.random.randint(k4, (N3,), 0, n_classes, dtype=jnp.int32)

    ref3 = _reference_dsne_loss(fts3, ys3, ftt3, yt3, margin=1.0)
    out4 = jax.block_until_ready(
        dsne_loss(fts3, ys3, ftt3, yt3, margin=1.0, use_bf16=False))
    assert jnp.allclose(out4, ref3, rtol=1e-3, atol=1e-3), (out4, ref3)

    print("KERNEL_OK")
</pallas_src>

<mosaic_0001>
module attributes {stable_mosaic.version = 11 : i64} {
  func.func @_dsne_kernel(%arg0: i32, %arg1: memref<128x128xf32, #tpu.memory_space<vmem>>, %arg2: memref<1x128xf32, #tpu.memory_space<vmem>>, %arg3: memref<1x128xi32, #tpu.memory_space<vmem>>, %arg4: memref<1x128xf32, #tpu.memory_space<vmem>>, %arg5: memref<8x128xf32, #tpu.memory_space<vmem>>, %arg6: memref<8x1xf32, #tpu.memory_space<vmem>>, %arg7: memref<8x1xi32, #tpu.memory_space<vmem>>, %arg8: memref<8x1xf32, #tpu.memory_space<vmem>>) attributes {dimension_semantics = [#tpu.dimension_semantics<parallel>], iteration_bounds = array<i64: 1>, scalar_prefetch = 0 : i64, scratch_operands = 0 : i64, tpu.core_type = #tpu.core_type<tc>, window_params = [{pipeline_mode = #tpu.pipeline_mode<synchronous>, transform_indices = @transform_0, window_bounds = array<i64: 128, 128>}, {pipeline_mode = #tpu.pipeline_mode<synchronous>, transform_indices = @transform_1, window_bounds = array<i64: 1, 128>}, {pipeline_mode = #tpu.pipeline_mode<synchronous>, transform_indices = @transform_2, window_bounds = array<i64: 1, 128>}, {pipeline_mode = #tpu.pipeline_mode<synchronous>, transform_indices = @transform_3, window_bounds = array<i64: 1, 128>}, {transform_indices = @transform_4, window_bounds = array<i64: 8, 128>}, {transform_indices = @transform_5, window_bounds = array<i64: 8, 1>}, {transform_indices = @transform_6, window_bounds = array<i64: 8, 1>}, {transform_indices = @transform_7, window_bounds = array<i64: 8, 1>}]} {
    %c0 = arith.constant 0 : index
    %c0_0 = arith.constant 0 : index
    %0 = vector.load %arg5[%c0, %c0_0] : memref<8x128xf32, #tpu.memory_space<vmem>>, vector<8x128xf32>
    %c0_1 = arith.constant 0 : index
    %c0_2 = arith.constant 0 : index
    %1 = vector.load %arg1[%c0_1, %c0_2] : memref<128x128xf32, #tpu.memory_space<vmem>>, vector<128x128xf32>
    %cst = arith.constant dense<0.000000e+00> : vector<8x128xf32>
    %2 = tpu.matmul %0, %1, %cst {dimension_numbers = #tpu.dot_dimension_numbers<[1], [0], [0], [1], [0, 0, 1, 1], [], []>} : vector<8x128xf32>, vector<128x128xf32>, vector<8x128xf32> -> vector<8x128xf32>
    %c0_3 = arith.constant 0 : index
    %c0_4 = arith.constant 0 : index
    %3 = vector.load %arg6[%c0_3, %c0_4] : memref<8x1xf32, #tpu.memory_space<vmem>>, vector<8x1xf32>
    %c0_5 = arith.constant 0 : index
    %c0_6 = arith.constant 0 : index
    %4 = vector.load %arg2[%c0_5, %c0_6] : memref<1x128xf32, #tpu.memory_space<vmem>>, vector<1x128xf32>
    %5 = vector.broadcast %3 : vector<8x1xf32> to vector<8x128xf32>
    %6 = vector.broadcast %4 : vector<1x128xf32> to vector<8x128xf32>
    %7 = arith.addf %5, %6 : vector<8x128xf32>
    %8 = arith.subf %7, %2 : vector<8x128xf32>
    %cst_7 = arith.constant 0.000000e+00 : f32
    %9 = vector.broadcast %cst_7 : f32 to vector<8x128xf32>
    %10 = arith.maximumf %8, %9 : vector<8x128xf32>
    %c0_8 = arith.constant 0 : index
    %c0_9 = arith.constant 0 : index
    %11 = vector.load %arg7[%c0_8, %c0_9] : memref<8x1xi32, #tpu.memory_space<vmem>>, vector<8x1xi32>
    %c0_10 = arith.constant 0 : index
    %c0_11 = arith.constant 0 : index
    %12 = vector.load %arg3[%c0_10, %c0_11] : memref<1x128xi32, #tpu.memory_space<vmem>>, vector<1x128xi32>
    %13 = vector.broadcast %11 : vector<8x1xi32> to vector<8x128xi32>
    %14 = vector.broadcast %12 : vector<1x128xi32> to vector<8x128xi32>
    %15 = arith.cmpi eq, %13, %14 : vector<8x128xi32>
    %c0_12 = arith.constant 0 : index
    %c0_13 = arith.constant 0 : index
    %16 = vector.load %arg4[%c0_12, %c0_13] : memref<1x128xf32, #tpu.memory_space<vmem>>, vector<1x128xf32>
    %17 = vector.broadcast %16 : vector<1x128xf32> to vector<8x128xf32>
    %18 = arith.addf %10, %17 : vector<8x128xf32>
    %19 = vector.broadcast %16 : vector<1x128xf32> to vector<8x128xf32>
    %20 = arith.subf %10, %19 : vector<8x128xf32>
    %cst_14 = arith.constant dense<0xFF800000> : vector<8xf32>
    %21 = vector.multi_reduction <maximumf>, %18, %cst_14 [1] : vector<8x128xf32> to vector<8xf32>
    %22 = vector.shape_cast %21 : vector<8xf32> to vector<8x1xf32>
    %cst_15 = arith.constant 0.000000e+00 : f32
    %23 = vector.broadcast %cst_15 : f32 to vector<8x128xf32>
    %24 = arith.select %15, %18, %23 : vector<8x128xi1>, vector<8x128xf32>
    %cst_16 = arith.constant dense<0xFF800000> : vector<8xf32>
    %25 = vector.multi_reduction <maximumf>, %24, %cst_16 [1] : vector<8x128xf32> to vector<8xf32>
    %26 = vector.shape_cast %25 : vector<8xf32> to vector<8x1xf32>
    %cst_17 = arith.constant 0x7F800000 : f32
    %27 = vector.broadcast %cst_17 : f32 to vector<8x128xf32>
    %28 = arith.select %15, %27, %20 : vector<8x128xi1>, vector<8x128xf32>
    %cst_18 = arith.constant dense<0x7F800000> : vector<8xf32>
    %29 = vector.multi_reduction <minimumf>, %28, %cst_18 [1] : vector<8x128xf32> to vector<8xf32>
    %30 = vector.shape_cast %29 : vector<8xf32> to vector<8x1xf32>
    %31 = arith.minimumf %30, %22 : vector<8x1xf32>
    %32 = arith.subf %26, %31 : vector<8x1xf32>
    %cst_19 = arith.constant 2.000000e+00 : f32
    %33 = vector.broadcast %cst_19 : f32 to vector<8x1xf32>
    %34 = arith.mulf %33, %32 : vector<8x1xf32>
    %cst_20 = arith.constant 1.000000e+00 : f32
    %35 = vector.broadcast %cst_20 : f32 to vector<8x1xf32>
    %36 = arith.addf %34, %35 : vector<8x1xf32>
    %cst_21 = arith.constant 0.000000e+00 : f32
    %37 = vector.broadcast %cst_21 : f32 to vector<8x1xf32>
    %38 = arith.maximumf %36, %37 : vector<8x1xf32>
    %c0_22 = arith.constant 0 : index
    %c0_23 = arith.constant 0 : index
    %39 = vector.load %arg8[%c0_22, %c0_23] : memref<8x1xf32, #tpu.memory_space<vmem>>, vector<8x1xf32>
    tpu.vector_store %arg8[%c0_22, %c0_23], %38 {strides = array<i32>} : memref<8x1xf32, #tpu.memory_space<vmem>>, vector<8x1xf32>,
    return
  }
  func.func @transform_0(%arg0: i32) -> (i32, i32) {
    %c0_i32 = arith.constant 0 : i32
    %c0_i32_0 = arith.constant 0 : i32
    %c0_i32_1 = arith.constant 0 : i32
    return %c0_i32, %c0_i32_0 : i32, i32
  }
  func.func @transform_1(%arg0: i32) -> (i32, i32) {
    %c0_i32 = arith.constant 0 : i32
    %c0_i32_0 = arith.constant 0 : i32
    %c0_i32_1 = arith.constant 0 : i32
    return %c0_i32, %c0_i32_0 : i32, i32
  }
  func.func @transform_2(%arg0: i32) -> (i32, i32) {
    %c0_i32 = arith.constant 0 : i32
    %c0_i32_0 = arith.constant 0 : i32
    %c0_i32_1 = arith.constant 0 : i32
    return %c0_i32, %c0_i32_0 : i32, i32
  }
  func.func @transform_3(%arg0: i32) -> (i32, i32) {
    %c0_i32 = arith.constant 0 : i32
    %c0_i32_0 = arith.constant 0 : i32
    %c0_i32_1 = arith.constant 0 : i32
    return %c0_i32, %c0_i32_0 : i32, i32
  }
  func.func @transform_4(%arg0: i32) -> (i32, i32) {
    %c0_i32 = arith.constant 0 : i32
    %c0_i32_0 = arith.constant 0 : i32
    return %arg0, %c0_i32 : i32, i32
  }
  func.func @transform_5(%arg0: i32) -> (i32, i32) {
    %c0_i32 = arith.constant 0 : i32
    %c0_i32_0 = arith.constant 0 : i32
    return %arg0, %c0_i32 : i32, i32
  }
  func.func @transform_6(%arg0: i32) -> (i32, i32) {
    %c0_i32 = arith.constant 0 : i32
    %c0_i32_0 = arith.constant 0 : i32
    return %arg0, %c0_i32 : i32, i32
  }
  func.func @transform_7(%arg0: i32) -> (i32, i32) {
    %c0_i32 = arith.constant 0 : i32
    %c0_i32_0 = arith.constant 0 : i32
    return %arg0, %c0_i32 : i32, i32
  }
}

module attributes {stable_mosaic.version = 11 : i64} {
  func.func @_dsne_kernel(%arg0: i32, %arg1: memref<128x128xf32, #tpu.memory_space<vmem>>, %arg2: memref<1x128xf32, #tpu.memory_space<vmem>>, %arg3: memref<1x128xi32, #tpu.memory_space<vmem>>, %arg4: memref<1x128xf32, #tpu.memory_space<vmem>>, %arg5: memref<8x128xf32, #tpu.memory_space<vmem>>, %arg6: memref<8x1xf32, #tpu.memory_space<vmem>>, %arg7: memref<8x1xi32, #tpu.memory_space<vmem>>, %arg8: memref<8x1xf32, #tpu.memory_space<vmem>>) attributes {dimension_semantics = [#tpu.dimension_semantics<parallel>], iteration_bounds = array<i64: 1>, scalar_prefetch = 0 : i64, scratch_operands = 0 : i64, tpu.core_type = #tpu.core_type<tc>, window_params = [{pipeline_mode = #tpu.pipeline_mode<synchronous>, transform_indices = @transform_0, window_bounds = array<i64: 128, 128>}, {pipeline_mode = #tpu.pipeline_mode<synchronous>, transform_indices = @transform_1, window_bounds = array<i64: 1, 128>}, {pipeline_mode = #tpu.pipeline_mode<synchronous>, transform_indices = @transform_2, window_bounds = array<i64: 1, 128>}, {pipeline_mode = #tpu.pipeline_mode<synchronous>, transform_indices = @transform_3, window_bounds = array<i64: 1, 128>}, {transform_indices = @transform_4, window_bounds = array<i64: 8, 128>}, {transform_indices = @transform_5, window_bounds = array<i64: 8, 1>}, {transform_indices = @transform_6, window_bounds = array<i64: 8, 1>}, {transform_indices = @transform_7, window_bounds = array<i64: 8, 1>}]} {
    %c0 = arith.constant 0 : index
    %c0_0 = arith.constant 0 : index
    %0 = vector.load %arg5[%c0, %c0_0] : memref<8x128xf32, #tpu.memory_space<vmem>>, vector<8x128xf32>
    %c0_1 = arith.constant 0 : index
    %c0_2 = arith.constant 0 : index
    %1 = vector.load %arg1[%c0_1, %c0_2] : memref<128x128xf32, #tpu.memory_space<vmem>>, vector<128x128xf32>
    %cst = arith.constant dense<0.000000e+00> : vector<8x128xf32>
    %2 = tpu.matmul %0, %1, %cst {dimension_numbers = #tpu.dot_dimension_numbers<[1], [0], [0], [1], [0, 0, 1, 1], [], []>} : vector<8x128xf32>, vector<128x128xf32>, vector<8x128xf32> -> vector<8x128xf32>
    %c0_3 = arith.constant 0 : index
    %c0_4 = arith.constant 0 : index
    %3 = vector.load %arg6[%c0_3, %c0_4] : memref<8x1xf32, #tpu.memory_space<vmem>>, vector<8x1xf32>
    %c0_5 = arith.constant 0 : index
    %c0_6 = arith.constant 0 : index
    %4 = vector.load %arg2[%c0_5, %c0_6] : memref<1x128xf32, #tpu.memory_space<vmem>>, vector<1x128xf32>
    %5 = vector.broadcast %3 : vector<8x1xf32> to vector<8x128xf32>
    %6 = vector.broadcast %4 : vector<1x128xf32> to vector<8x128xf32>
    %7 = arith.addf %5, %6 : vector<8x128xf32>
    %8 = arith.subf %7, %2 : vector<8x128xf32>
    %cst_7 = arith.constant 0.000000e+00 : f32
    %9 = vector.broadcast %cst_7 : f32 to vector<8x128xf32>
    %10 = arith.maximumf %8, %9 : vector<8x128xf32>
    %c0_8 = arith.constant 0 : index
    %c0_9 = arith.constant 0 : index
    %11 = vector.load %arg7[%c0_8, %c0_9] : memref<8x1xi32, #tpu.memory_space<vmem>>, vector<8x1xi32>
    %c0_10 = arith.constant 0 : index
    %c0_11 = arith.constant 0 : index
    %12 = vector.load %arg3[%c0_10, %c0_11] : memref<1x128xi32, #tpu.memory_space<vmem>>, vector<1x128xi32>
    %13 = vector.broadcast %11 : vector<8x1xi32> to vector<8x128xi32>
    %14 = vector.broadcast %12 : vector<1x128xi32> to vector<8x128xi32>
    %15 = arith.cmpi eq, %13, %14 : vector<8x128xi32>
    %c0_12 = arith.constant 0 : index
    %c0_13 = arith.constant 0 : index
    %16 = vector.load %arg4[%c0_12, %c0_13] : memref<1x128xf32, #tpu.memory_space<vmem>>, vector<1x128xf32>
    %17 = vector.broadcast %16 : vector<1x128xf32> to vector<8x128xf32>
    %18 = arith.addf %10, %17 : vector<8x128xf32>
    %19 = vector.broadcast %16 : vector<1x128xf32> to vector<8x128xf32>
    %20 = arith.subf %10, %19 : vector<8x128xf32>
    %cst_14 = arith.constant dense<0xFF800000> : vector<8xf32>
    %21 = vector.multi_reduction <maximumf>, %18, %cst_14 [1] : vector<8x128xf32> to vector<8xf32>
    %22 = vector.shape_cast %21 : vector<8xf32> to vector<8x1xf32>
    %cst_15 = arith.constant 0.000000e+00 : f32
    %23 = vector.broadcast %cst_15 : f32 to vector<8x128xf32>
    %24 = arith.select %15, %18, %23 : vector<8x128xi1>, vector<8x128xf32>
    %cst_16 = arith.constant dense<0xFF800000> : vector<8xf32>
    %25 = vector.multi_reduction <maximumf>, %24, %cst_16 [1] : vector<8x128xf32> to vector<8xf32>
    %26 = vector.shape_cast %25 : vector<8xf32> to vector<8x1xf32>
    %cst_17 = arith.constant 0x7F800000 : f32
    %27 = vector.broadcast %cst_17 : f32 to vector<8x128xf32>
    %28 = arith.select %15, %27, %20 : vector<8x128xi1>, vector<8x128xf32>
    %cst_18 = arith.constant dense<0x7F800000> : vector<8xf32>
    %29 = vector.multi_reduction <minimumf>, %28, %cst_18 [1] : vector<8x128xf32> to vector<8xf32>
    %30 = vector.shape_cast %29 : vector<8xf32> to vector<8x1xf32>
    %31 = arith.minimumf %30, %22 : vector<8x1xf32>
    %32 = arith.subf %26, %31 : vector<8x1xf32>
    %cst_19 = arith.constant 2.000000e+00 : f32
    %33 = vector.broadcast %cst_19 : f32 to vector<8x1xf32>
    %34 = arith.mulf %33, %32 : vector<8x1xf32>
    %cst_20 = arith.constant 1.000000e+00 : f32
    %35 = vector.broadcast %cst_20 : f32 to vector<8x1xf32>
    %36 = arith.addf %34, %35 : vector<8x1xf32>
    %cst_21 = arith.constant 0.000000e+00 : f32
    %37 = vector.broadcast %cst_21 : f32 to vector<8x1xf32>
    %38 = arith.maximumf %36, %37 : vector<8x1xf32>
    %c0_22 = arith.constant 0 : index
    %c0_23 = arith.constant 0 : index
    %39 = vector.load %arg8[%c0_22, %c0_23] : memref<8x1xf32, #tpu.memory_space<vmem>>, vector<8x1xf32>
    tpu.vector_store %arg8[%c0_22, %c0_23], %38 {strides = array<i32>} : memref<8x1xf32, #tpu.memory_space<vmem>>, vector<8x1xf32>,
    return
  }
  func.func @transform_0(%arg0: i32) -> (i32, i32) {
    %c0_i32 = arith.constant 0 : i32
    %c0_i32_0 = arith.constant 0 : i32
    %c0_i32_1 = arith.constant 0 : i32
    return %c0_i32, %c0_i32_0 : i32, i32
  }
  func.func @transform_1(%arg0: i32) -> (i32, i32) {
    %c0_i32 = arith.constant 0 : i32
    %c0_i32_0 = arith.constant 0 : i32
    %c0_i32_1 = arith.constant 0 : i32
    return %c0_i32, %c0_i32_0 : i32, i32
  }
  func.func @transform_2(%arg0: i32) -> (i32, i32) {
    %c0_i32 = arith.constant 0 : i32
    %c0_i32_0 = arith.constant 0 : i32
    %c0_i32_1 = arith.constant 0 : i32
    return %c0_i32, %c0_i32_0 : i32, i32
  }
  func.func @transform_3(%arg0: i32) -> (i32, i32) {
    %c0_i32 = arith.constant 0 : i32
    %c0_i32_0 = arith.constant 0 : i32
    %c0_i32_1 = arith.constant 0 : i32
    return %c0_i32, %c0_i32_0 : i32, i32
  }
  func.func @transform_4(%arg0: i32) -> (i32, i32) {
    %c0_i32 = arith.constant 0 : i32
    %c0_i32_0 = arith.constant 0 : i32
    return %arg0, %c0_i32 : i32, i32
  }
  func.func @transform_5(%arg0: i32) -> (i32, i32) {
    %c0_i32 = arith.constant 0 : i32
    %c0_i32_0 = arith.constant 0 : i32
    return %arg0, %c0_i32 : i32, i32
  }
  func.func @transform_6(%arg0: i32) -> (i32, i32) {
    %c0_i32 = arith.constant 0 : i32
    %c0_i32_0 = arith.constant 0 : i32
    return %arg0, %c0_i32 : i32, i32
  }
  func.func @transform_7(%arg0: i32) -> (i32, i32) {
    %c0_i32 = arith.constant 0 : i32
    %c0_i32_0 = arith.constant 0 : i32
    return %arg0, %c0_i32 : i32, i32
  }
}

</mosaic_0001>

<bundles_post_ra>
// kernel: tpu_custom_call.1
= control target key start
LH: loop header
LB: loop body
LE: loop exit
PB: predicated region body
PF: predicated region fallthrough
CT: control target
= control target key end

     0   :  { %12 = vsyncpa [#allocation3], 0  ;;  %s293_s24 = smov [#allocation2]   ;;  %s373_s0 = inlined_call_operand.hbm [shape: f32[128,128], index: 0, kind: input, shape index: {}]   ;;  %s374_s1 = inlined_call_operand.vmem [shape: f32[1,128], index: 1, kind: input, shape index: {}]   ;;  %s375_s2 = inlined_call_operand.vmem [shape: s32[1,128], index: 2, kind: input, shape index: {}]   ;;  %s376_s3 = inlined_call_operand.vmem [shape: f32[1,128], index: 3, kind: input, shape index: {}]   ;;  %s377_s4 = inlined_call_operand.vmem [shape: f32[8,128], index: 4, kind: input, shape index: {}]   ;;  %s378_s5 = inlined_call_operand.vmem [shape: f32[8,1], index: 5, kind: input, shape index: {}]   ;;  %s379_s6 = inlined_call_operand.vmem [shape: s32[8,1], index: 6, kind: input, shape index: {}]   ;;  %s380_s7 = inlined_call_operand.vmem [shape: f32[8,1], index: 7, kind: output, shape index: {}]  }
   0x1   :  { %s18_s25 = sshll.u32 %s293_s24, 4  ;;  %s269_s28 = scalar_lea.hbm %s373_s0, 2048  ;;  %s19_s25 = int_to_ptr.vmem [resolvable:$true] %s18_s25 }
   0x2   :  { %p270_p0 = scmp.ne.s32.totalorder %s373_s0, %s269_s28  ;;  %p273_p1 = scmp.lt.u32.totalorder %s269_s28, %s373_s0 }
   0x4   :  { %p275_p2 = pnand %p273_p1, %p270_p0 }
   0x6   :  { %278 = shalt.err (!%p275_p2)
}
   0x7   :  { %s279_s10 = scalar_lea.vmem %s19_s25, 2048  ;;  %p284_p4 = scmp.lt.s32.totalorder %s19_s25, %s19_s25 }
   0x8   :  { %p280_p3 = scmp.ne.s32.totalorder %s19_s25, %s279_s10  ;;  %p285_p5 = scmp.lt.s32.totalorder %s279_s10, %s279_s10 }
   0xa   :  { %p286_p6 = por %p285_p5, %p284_p4 }
   0xc   :  { %p287_p7 = pnand %p286_p6, %p280_p3 }
   0xe   :  { %290 = shalt.err (!%p287_p7)
}
   0xf   :  { %s294_s11 = smov 128   ;;  %s295_s12 = smov 8  }
  0x10   :  { %24 = dma.hbm_to_vmem [thread:$0]  %s373_s0, 2048, %s19_s25, [#allocation3], %s294_s11, %s294_s11, %s295_s12  }
  0x11   :  { %291 = dma.done.wait [#allocation3], 2048  }
  0x12   :  { %292 = vsyncadd [#allocation3], 4294965248  ;;  %v296_v0 = vmov 0.0|0.0   ;;  %vm297_vm0 = vmmov 0   ;;  %v298_v1 = vmov 0.0   ;;  %v299_v2 = vmov 0  }
  0x13   :  { %237 = vmatprep.subr.bf16.mxu0 %v296_v0  ;;  %234 = vmatprep.mubr.msk.f32.mxu0 %vm297_vm0, %v298_v1  ;;  %v41_v3 = vld [vmem:[#allocation2] sm:$0xff]  ;;  %v42_v4 = vld [vmem:[#allocation2 + $0x8] sm:$0xff]  ;;  %v43_v5 = vld [vmem:[#allocation2 + $0x10] sm:$0xff]  ;;  %vm175_vm2 = vcmask 7168  }
  0x14   :  { %268 = vset.pattern.permute.xlu0 %v299_v2  ;;  %v238_v6 = vpack.c.bf16 %v42_v4, %v41_v3  ;;  %v44_v7 = vld [vmem:[#allocation2 + $0x18] sm:$0xff]  ;;  %v45_v9 = vld [vmem:[#allocation2 + $0x20] sm:$0xff]  ;;  %v46_v10 = vld [vmem:[#allocation2 + $0x28] sm:$0xff] }
  0x15   :  { %v241_v8 = vpack.c.bf16 %v44_v7, %v43_v5  ;;  %v127_v11 = vld [vmem:[%s378_s5] sm:$0xff]  ;;  %v244_v12 = vpack.c.bf16 %v46_v10, %v45_v9  ;;  %v47_v14 = vld [vmem:[#allocation2 + $0x30] sm:$0xff]  ;;  %v48_v15 = vld [vmem:[#allocation2 + $0x38] sm:$0xff] }
  0x16   :  { %239 = vmatpush3.bf16.msra.mxu0 %v238_v6  ;;  %131 = vperm.xlu0 %268, %v127_v11   ;;  %v143_v13 = vld [vmem:[%s379_s6] sm:$0xff]  ;;  %v247_v16 = vpack.c.bf16 %v48_v15, %v47_v14  ;;  %v50_v18 = vld [vmem:[#allocation2 + $0x48] sm:$0xff]  ;;  %v51_v20 = vld [vmem:[#allocation2 + $0x50] sm:$0xff] }
  0x17   :  { %240 = vmatprep.subr.bf16.mxu0 %v296_v0  ;;  %v49_v17 = vld [vmem:[#allocation2 + $0x40] sm:$0xff]  ;;  %v52_v21 = vld [vmem:[#allocation2 + $0x58] sm:$0xff]  ;;  %v54_v24 = vld [vmem:[#allocation2 + $0x68] sm:$0xff] }
  0x18   :  { %v250_v19 = vpack.c.bf16 %v50_v18, %v49_v17  ;;  %v253_v22 = vpack.c.bf16 %v52_v21, %v51_v20  ;;  %v53_v23 = vld [vmem:[#allocation2 + $0x60] sm:$0xff]  ;;  %v55_v26 = vld [vmem:[#allocation2 + $0x70] sm:$0xff]  ;;  %v56_v27 = vld [vmem:[#allocation2 + $0x78] sm:$0xff] }
  0x19   :  { %v256_v25 = vpack.c.bf16 %v54_v24, %v53_v23  ;;  %v259_v28 = vpack.c.bf16 %v56_v27, %v55_v26  ;;  %v40_v29 = vld [vmem:[%s377_s4] sm:$0xff] }
  0x1a   :  { %242 = vmatpush3.bf16.msra.mxu0 %v241_v8  ;;  %146 = vperm.xlu0 %268, %v143_v13   ;;  %v182_v30 = vld [vmem:[%s374_s1] ss:$0 sm:$0xff] }
  0x1b   :  { %243 = vmatprep.subr.bf16.mxu0 %v296_v0  ;;  %v184_v36 = vld [vmem:[%s376_s3] ss:$0 sm:$0xff] }
  0x1c   :  { %v183_v37 = vld [vmem:[%s375_s2] ss:$0 sm:$0xff] }
  0x1e   :  { %245 = vmatpush3.bf16.msra.mxu0 %v244_v12 }
  0x1f   :  { %246 = vmatprep.subr.bf16.mxu0 %v296_v0 }
  0x22   :  { %248 = vmatpush3.bf16.msra.mxu0 %v247_v16 }
  0x23   :  { %249 = vmatprep.subr.bf16.mxu0 %v296_v0 }
  0x26   :  { %251 = vmatpush3.bf16.msra.mxu0 %v250_v19 }
  0x27   :  { %252 = vmatprep.subr.bf16.mxu0 %v296_v0 }
  0x2a   :  { %254 = vmatpush3.bf16.msra.mxu0 %v253_v22 }
  0x2b   :  { %255 = vmatprep.subr.bf16.mxu0 %v296_v0 }
  0x2e   :  { %257 = vmatpush3.bf16.msra.mxu0 %v256_v25 }
  0x2f   :  { %258 = vmatprep.subr.bf16.mxu0 %v296_v0 }
  0x32   :  { %260 = vmatpush3.bf16.msra.mxu0 %v259_v28 }
  0x35   :  { %235 = vmatmul.mubr.f32.vlgmr.msra.gmra.mrb[0].mxu0 %v40_v29 }
  0x95   :  { %v132_v31 = vpop.permute.xlu0 %131 }
  0x96   :  { %v140_v32 = vadd.f32 %v182_v30, %v132_v31 }
  0x99   :  { %v147_v38 = vpop.permute.xlu0 %146 }
  0x9a   :  { %vm152_vm1 = vcmp.eq.s32.totalorder %v147_v38, %v183_v37 }
 0x108   :  { %v123_v33 = vpop.f32.mrb[0].mxu0 }
 0x109   :  { %v141_v34 = vsub.f32 %v140_v32, %v123_v33  ;;  %v236_v35 = vpop.f32.mrb[1].mxu0 }
 0x10b   :  { %v142_v39 = vmax.f32 %v141_v34, 0.0 }
 0x10d   :  { %v160_v40 = vadd.f32 %v184_v36, %v142_v39  ;;  %v161_v41 = vsub.f32 %v142_v39, %v184_v36 }
 0x10f   :  { %162 = vmax.xlane.f32.xlu1 %v160_v40  ;;  %v164_v42 = vsel %vm152_vm1, %v160_v40, 0.0  ;;  %v167_v43 = vsel %vm152_vm1, inf, %v161_v41 }
 0x110   :  { %165 = vmax.xlane.f32.xlu0 %v164_v42 }
 0x113   :  { %168 = vmin.xlane.f32.xlu1 %v167_v43 }
 0x19c   :  { %v163_v44 = vpop.xlane.xlu1 %162 }
 0x19d   :  { %v166_v47 = vpop.xlane.xlu0 %165 }
 0x1a0   :  { %v169_v45 = vpop.xlane.xlu1 %168 }
 0x1a1   :  { %v170_v46 = vmin.f32 %v169_v45, %v163_v44 }
 0x1a3   :  { %v171_v48 = vsub.f32 %v166_v47, %v170_v46 }
 0x1a5   :  { %v172_v49 = vmul.f32 2.0, %v171_v48 }
 0x1a7   :  { %v173_v50 = vadd.f32 1.0, %v172_v49 }
 0x1a9   :  { %v174_v51 = vmax.f32 %v173_v50, 0.0 }
 0x1ab   :  { %176 = vst.msk [vmem:[%s380_s7] sm:$0xff] %vm175_vm2, %v174_v51 }
 0x1ac   :  { %181 = vsyncpa [#allocation3], 1 }

// kernel: tpu_custom_call.1
= control target key start
LH: loop header
LB: loop body
LE: loop exit
PB: predicated region body
PF: predicated region fallthrough
CT: control target
= control target key end

     0   :  { %12 = vsyncpa [#allocation3], 0  ;;  %s293_s24 = smov [#allocation2]   ;;  %s373_s0 = inlined_call_operand.hbm [shape: f32[128,128], index: 0, kind: input, shape index: {}]   ;;  %s374_s1 = inlined_call_operand.vmem [shape: f32[1,128], index: 1, kind: input, shape index: {}]   ;;  %s375_s2 = inlined_call_operand.vmem [shape: s32[1,128], index: 2, kind: input, shape index: {}]   ;;  %s376_s3 = inlined_call_operand.vmem [shape: f32[1,128], index: 3, kind: input, shape index: {}]   ;;  %s377_s4 = inlined_call_operand.vmem [shape: f32[8,128], index: 4, kind: input, shape index: {}]   ;;  %s378_s5 = inlined_call_operand.vmem [shape: f32[8,1], index: 5, kind: input, shape index: {}]   ;;  %s379_s6 = inlined_call_operand.vmem [shape: s32[8,1], index: 6, kind: input, shape index: {}]   ;;  %s380_s7 = inlined_call_operand.vmem [shape: f32[8,1], index: 7, kind: output, shape index: {}]  }
   0x1   :  { %s18_s25 = sshll.u32 %s293_s24, 4  ;;  %s269_s28 = scalar_lea.hbm %s373_s0, 2048  ;;  %s19_s25 = int_to_ptr.vmem [resolvable:$true] %s18_s25 }
   0x2   :  { %p270_p0 = scmp.ne.s32.totalorder %s373_s0, %s269_s28  ;;  %p273_p1 = scmp.lt.u32.totalorder %s269_s28, %s373_s0 }
   0x4   :  { %p275_p2 = pnand %p273_p1, %p270_p0 }
   0x6   :  { %278 = shalt.err (!%p275_p2)
}
   0x7   :  { %s279_s10 = scalar_lea.vmem %s19_s25, 2048  ;;  %p284_p4 = scmp.lt.s32.totalorder %s19_s25, %s19_s25 }
   0x8   :  { %p280_p3 = scmp.ne.s32.totalorder %s19_s25, %s279_s10  ;;  %p285_p5 = scmp.lt.s32.totalorder %s279_s10, %s279_s10 }
   0xa   :  { %p286_p6 = por %p285_p5, %p284_p4 }
   0xc   :  { %p287_p7 = pnand %p286_p6, %p280_p3 }
   0xe   :  { %290 = shalt.err (!%p287_p7)
}
   0xf   :  { %s294_s11 = smov 128   ;;  %s295_s12 = smov 8  }
  0x10   :  { %24 = dma.hbm_to_vmem [thread:$0]  %s373_s0, 2048, %s19_s25, [#allocation3], %s294_s11, %s294_s11, %s295_s12  }
  0x11   :  { %291 = dma.done.wait [#allocation3], 2048  }
  0x12   :  { %292 = vsyncadd [#allocation3], 4294965248  ;;  %v296_v0 = vmov 0.0|0.0   ;;  %vm297_vm0 = vmmov 0   ;;  %v298_v1 = vmov 0.0   ;;  %v299_v2 = vmov 0  }
  0x13   :  { %237 = vmatprep.subr.bf16.mxu0 %v296_v0  ;;  %234 = vmatprep.mubr.msk.f32.mxu0 %vm297_vm0, %v298_v1  ;;  %v41_v3 = vld [vmem:[#allocation2] sm:$0xff]  ;;  %v42_v4 = vld [vmem:[#allocation2 + $0x8] sm:$0xff]  ;;  %v43_v5 = vld [vmem:[#allocation2 + $0x10] sm:$0xff]  ;;  %vm175_vm2 = vcmask 7168  }
  0x14   :  { %268 = vset.pattern.permute.xlu0 %v299_v2  ;;  %v238_v6 = vpack.c.bf16 %v42_v4, %v41_v3  ;;  %v44_v7 = vld [vmem:[#allocation2 + $0x18] sm:$0xff]  ;;  %v45_v9 = vld [vmem:[#allocation2 + $0x20] sm:$0xff]  ;;  %v46_v10 = vld [vmem:[#allocation2 + $0x28] sm:$0xff] }
  0x15   :  { %v241_v8 = vpack.c.bf16 %v44_v7, %v43_v5  ;;  %v127_v11 = vld [vmem:[%s378_s5] sm:$0xff]  ;;  %v244_v12 = vpack.c.bf16 %v46_v10, %v45_v9  ;;  %v47_v14 = vld [vmem:[#allocation2 + $0x30] sm:$0xff]  ;;  %v48_v15 = vld [vmem:[#allocation2 + $0x38] sm:$0xff] }
  0x16   :  { %239 = vmatpush3.bf16.msra.mxu0 %v238_v6  ;;  %131 = vperm.xlu0 %268, %v127_v11   ;;  %v143_v13 = vld [vmem:[%s379_s6] sm:$0xff]  ;;  %v247_v16 = vpack.c.bf16 %v48_v15, %v47_v14  ;;  %v50_v18 = vld [vmem:[#allocation2 + $0x48] sm:$0xff]  ;;  %v51_v20 = vld [vmem:[#allocation2 + $0x50] sm:$0xff] }
  0x17   :  { %240 = vmatprep.subr.bf16.mxu0 %v296_v0  ;;  %v49_v17 = vld [vmem:[#allocation2 + $0x40] sm:$0xff]  ;;  %v52_v21 = vld [vmem:[#allocation2 + $0x58] sm:$0xff]  ;;  %v54_v24 = vld [vmem:[#allocation2 + $0x68] sm:$0xff] }
  0x18   :  { %v250_v19 = vpack.c.bf16 %v50_v18, %v49_v17  ;;  %v253_v22 = vpack.c.bf16 %v52_v21, %v51_v20  ;;  %v53_v23 = vld [vmem:[#allocation2 + $0x60] sm:$0xff]  ;;  %v55_v26 = vld [vmem:[#allocation2 + $0x70] sm:$0xff]  ;;  %v56_v27 = vld [vmem:[#allocation2 + $0x78] sm:$0xff] }
  0x19   :  { %v256_v25 = vpack.c.bf16 %v54_v24, %v53_v23  ;;  %v259_v28 = vpack.c.bf16 %v56_v27, %v55_v26  ;;  %v40_v29 = vld [vmem:[%s377_s4] sm:$0xff] }
  0x1a   :  { %242 = vmatpush3.bf16.msra.mxu0 %v241_v8  ;;  %146 = vperm.xlu0 %268, %v143_v13   ;;  %v182_v30 = vld [vmem:[%s374_s1] ss:$0 sm:$0xff] }
  0x1b   :  { %243 = vmatprep.subr.bf16.mxu0 %v296_v0  ;;  %v184_v36 = vld [vmem:[%s376_s3] ss:$0 sm:$0xff] }
  0x1c   :  { %v183_v37 = vld [vmem:[%s375_s2] ss:$0 sm:$0xff] }
  0x1e   :  { %245 = vmatpush3.bf16.msra.mxu0 %v244_v12 }
  0x1f   :  { %246 = vmatprep.subr.bf16.mxu0 %v296_v0 }
  0x22   :  { %248 = vmatpush3.bf16.msra.mxu0 %v247_v16 }
  0x23   :  { %249 = vmatprep.subr.bf16.mxu0 %v296_v0 }
  0x26   :  { %251 = vmatpush3.bf16.msra.mxu0 %v250_v19 }
  0x27   :  { %252 = vmatprep.subr.bf16.mxu0 %v296_v0 }
  0x2a   :  { %254 = vmatpush3.bf16.msra.mxu0 %v253_v22 }
  0x2b   :  { %255 = vmatprep.subr.bf16.mxu0 %v296_v0 }
  0x2e   :  { %257 = vmatpush3.bf16.msra.mxu0 %v256_v25 }
  0x2f   :  { %258 = vmatprep.subr.bf16.mxu0 %v296_v0 }
  0x32   :  { %260 = vmatpush3.bf16.msra.mxu0 %v259_v28 }
  0x35   :  { %235 = vmatmul.mubr.f32.vlgmr.msra.gmra.mrb[0].mxu0 %v40_v29 }
  0x95   :  { %v132_v31 = vpop.permute.xlu0 %131 }
  0x96   :  { %v140_v32 = vadd.f32 %v182_v30, %v132_v31 }
  0x99   :  { %v147_v38 = vpop.permute.xlu0 %146 }
  0x9a   :  { %vm152_vm1 = vcmp.eq.s32.totalorder %v147_v38, %v183_v37 }
 0x108   :  { %v123_v33 = vpop.f32.mrb[0].mxu0 }
 0x109   :  { %v141_v34 = vsub.f32 %v140_v32, %v123_v33  ;;  %v236_v35 = vpop.f32.mrb[1].mxu0 }
 0x10b   :  { %v142_v39 = vmax.f32 %v141_v34, 0.0 }
 0x10d   :  { %v160_v40 = vadd.f32 %v184_v36, %v142_v39  ;;  %v161_v41 = vsub.f32 %v142_v39, %v184_v36 }
 0x10f   :  { %162 = vmax.xlane.f32.xlu1 %v160_v40  ;;  %v164_v42 = vsel %vm152_vm1, %v160_v40, 0.0  ;;  %v167_v43 = vsel %vm152_vm1, inf, %v161_v41 }
 0x110   :  { %165 = vmax.xlane.f32.xlu0 %v164_v42 }
 0x113   :  { %168 = vmin.xlane.f32.xlu1 %v167_v43 }
 0x19c   :  { %v163_v44 = vpop.xlane.xlu1 %162 }
 0x19d   :  { %v166_v47 = vpop.xlane.xlu0 %165 }
 0x1a0   :  { %v169_v45 = vpop.xlane.xlu1 %168 }
 0x1a1   :  { %v170_v46 = vmin.f32 %v169_v45, %v163_v44 }
 0x1a3   :  { %v171_v48 = vsub.f32 %v166_v47, %v170_v46 }
 0x1a5   :  { %v172_v49 = vmul.f32 2.0, %v171_v48 }
 0x1a7   :  { %v173_v50 = vadd.f32 1.0, %v172_v49 }
 0x1a9   :  { %v174_v51 = vmax.f32 %v173_v50, 0.0 }
 0x1ab   :  { %176 = vst.msk [vmem:[%s380_s7] sm:$0xff] %vm175_vm2, %v174_v51 }
 0x1ac   :  { %181 = vsyncpa [#allocation3], 1 }

</bundles_post_ra>
